<compile_context>
chip_gen: v6e
topology: v6e:2x2x1
jax: 0.10.0
libtpu: 0.0.40
codegen_flags: <defaults>
</compile_context>

<pallas_src>
import functools

import jax
import jax.numpy as jnp
from jax import lax
from jax.experimental import pallas as pl
from jax.experimental.pallas import tpu as pltpu


def _round_up(x, m):
    return ((x + m - 1) // m) * m


def _vmem_padded_bytes(shape, dtype):
    """Bytes an array occupies in VMEM after (sublane, lane) layout padding."""
    itemsize = jnp.dtype(dtype).itemsize
    sub_mult = {4: 8, 2: 16, 1: 32}.get(itemsize, 8)
    dims = list(shape)
    if len(dims) == 1:
        dims = [1] + dims
    dims[-1] = _round_up(dims[-1], 128)
    dims[-2] = _round_up(dims[-2], sub_mult)
    n = 1
    for d in dims:
        n *= int(d)
    return n * itemsize


def _gnn_block_kernel(g_ref, x_ref, w_ref, eps_ref, gamma_ref, beta_ref, mask_ref,
                      o_ref, h_ref, *, couts, blockdiag, matmul_dtype):
    """All GIN layers fused; h stays resident in VMEM scratch between layers.

    g_ref:     (B*N, B*N) bf16 block-diag   [blockdiag=True]
               or (B, N, N) bf16            [blockdiag=False]
    x_ref:     (B, N, Cpad) f32   input node features (zero-padded)
    w_ref:     (L, Cpad, Cpad)    per-layer linear weights, already matmul_dtype
    eps_ref:   (L,) f32 SMEM      per-layer GIN eps scalars
    gamma_ref: (L, N, 1) f32      BatchNorm1d(G_size) weight
    beta_ref:  (L, N, 1) f32      BatchNorm1d(G_size) bias
    mask_ref:  (B, N, 1) f32      node mask
    o_ref:     (B, N, Cpad)       lane-dense output (wrapper slices pad lanes/rows)
    h_ref:     VMEM (B, N, Cpad) f32 scratch — layer-resident activations
    """
    B, N, Cpad = h_ref.shape
    L = len(couts)

    node_mask = mask_ref[...].astype(jnp.float32)            # (B, N, 1)

    # Resident activations start as the (padded) input features.
    h_ref[...] = x_ref[...].astype(jnp.float32)

    for l in range(L):                    # layers statically unrolled (L small)
        eps = eps_ref[l]
        w_mm = w_ref[l]                                       # (Cpad, Cpad)

        if blockdiag:
            # --- one merged MXU matmul for all batches (small B*N) ---
            h = h_ref[...]                                    # (B, N, Cpad) f32
            h_mm = h.reshape(B * N, Cpad).astype(matmul_dtype)
            agg = jnp.dot(g_ref[...], h_mm,
                          preferred_element_type=jnp.float32).reshape(B, N, Cpad)
            z = agg + (1.0 + eps) * h
            y = jnp.dot(z.reshape(B * N, Cpad).astype(matmul_dtype), w_mm,
                        preferred_element_type=jnp.float32)
            y = jnp.maximum(y, 0.0).reshape(B, N, Cpad)
        else:
            # --- per-batch path: agg + linear fused, written back into h_ref ---
            for b in range(B):
                hb = h_ref[b]                                 # (N, Cpad) f32
                agg = jnp.dot(g_ref[b], hb.astype(matmul_dtype),
                              preferred_element_type=jnp.float32)
                zb = agg + (1.0 + eps) * hb
                yb = jnp.dot(zb.astype(matmul_dtype), w_mm,
                             preferred_element_type=jnp.float32)
                h_ref[b] = jnp.maximum(yb, 0.0)
            y = h_ref[...]

        # --- BatchNorm1d(G_size), training stats, single pass.
        #     Pad lanes of y are exactly zero (zero W pad columns, relu(0)=0), so
        #     dividing by the true B*Cout gives exact per-node statistics.
        inv_count = 1.0 / float(B * couts[l])
        s1 = jnp.sum(y, axis=2, keepdims=True)                # (B, N, 1)
        s2 = jnp.sum(y * y, axis=2, keepdims=True)            # (B, N, 1)
        mean = jnp.sum(s1, axis=0, keepdims=True) * inv_count     # (1, N, 1)
        mean_sq = jnp.sum(s2, axis=0, keepdims=True) * inv_count  # (1, N, 1)
        var = jnp.maximum(mean_sq - mean * mean, 0.0)
        inv_std = lax.rsqrt(var + 1e-5)                       # EUP
        gamma = gamma_ref[l][None, :, :]                      # (1, N, 1)
        beta = beta_ref[l][None, :, :]
        y = (y - mean) * (inv_std * gamma) + beta

        # --- node mask, write back into the resident buffer ---
        h_ref[...] = y * node_mask

    # Single lane-dense HBM store for the whole block.
    o_ref[...] = h_ref[...].astype(o_ref.dtype)


class GNNBlockPallas:
    """JAX/Pallas re-implementation of GNNBlock (stack of GIN layers), fully fused."""

    def __init__(self, g_size, in_size, hidden_size=(32, 32), residual=False,
                 matmul_dtype=jnp.bfloat16, out_dtype=jnp.float32, key=None):
        self.g_size = g_size
        self.in_size = in_size
        self.hidden_size = tuple(hidden_size)
        self.residual = residual
        self.matmul_dtype = matmul_dtype
        self.out_dtype = out_dtype          # set to jnp.bfloat16 to halve writeback
        if key is None:
            key = jax.random.PRNGKey(0)

        L = len(self.hidden_size)
        self.cpad = _round_up(max(self.in_size, *self.hidden_size), 128)

        # Stacked, zero-padded per-layer parameters (lane-dense weight slabs).
        w_stack = jnp.zeros((L, self.cpad, self.cpad), jnp.float32)
        cin = in_size
        for l, cout in enumerate(self.hidden_size):
            key, wk = jax.random.split(key)
            bound = 1.0 / (cin ** 0.5)
            w = jax.random.uniform(wk, (cin, cout), jnp.float32, -bound, bound)
            w_stack = w_stack.at[l, :cin, :cout].set(w)   # nn.Linear init, bias=False
            cin = cout
        # Pass weights already in matmul dtype: halves W DMA, no per-layer cast.
        self.w_stack_mm = w_stack.astype(self.matmul_dtype)
        self.eps_stack = jnp.zeros((L,), jnp.float32)               # GIN eps, init 0
        self.gamma_stack = jnp.ones((L, g_size, 1), jnp.float32)    # BN affine
        self.beta_stack = jnp.zeros((L, g_size, 1), jnp.float32)
        self.out_size = cin + int(self.residual) * self.in_size

    def __call__(self, G, x, mask):
        B, N, _ = G.shape
        L = len(self.hidden_size)
        Cpad = self.cpad
        Npad = _round_up(N, 16)        # tile-aligned sub-views / flattens (bf16-safe)
        pad_n = Npad - N

        if mask.ndim == 2:
            mask = mask[..., None]

        # Lane-dense, row-padded input slabs (f32 activations, bf16 adjacency).
        x_pad = jnp.pad(x.astype(jnp.float32),
                        ((0, 0), (0, pad_n), (0, Cpad - self.in_size)))
        mask_pad = jnp.pad(mask.astype(jnp.float32), ((0, 0), (0, pad_n), (0, 0)))
        g_pad = jnp.pad(G.astype(self.matmul_dtype), ((0, 0), (0, pad_n), (0, pad_n)))
        gamma = jnp.pad(self.gamma_stack, ((0, 0), (0, pad_n), (0, 0)),
                        constant_values=1.0)
        beta = jnp.pad(self.beta_stack, ((0, 0), (0, pad_n), (0, 0)))

        # Small graphs: merge the B aggregation matmuls into one block-diag matmul.
        blockdiag = (B * Npad) <= 1024
        if blockdiag:
            eye_b = jnp.eye(B, dtype=g_pad.dtype)
            g_in = (eye_b[:, None, :, None] * g_pad[:, :, None, :]).reshape(
                B * Npad, B * Npad)
        else:
            g_in = g_pad

        # VMEM budget from actual (layout-padded) buffer sizes + headroom.
        bufs = [
            (g_in.shape, g_in.dtype),
            (x_pad.shape, x_pad.dtype),
            (self.w_stack_mm.shape, self.w_stack_mm.dtype),
            (gamma.shape, gamma.dtype),
            (beta.shape, beta.dtype),
            (mask_pad.shape, mask_pad.dtype),
            ((B, Npad, Cpad), self.out_dtype),       # output
            ((B, Npad, Cpad), jnp.float32),          # resident h scratch
        ]
        total = sum(_vmem_padded_bytes(s, d) for s, d in bufs)
        vmem_limit = int(min(int(total * 1.5) + (4 << 20), 100 << 20))

        kernel = functools.partial(_gnn_block_kernel,
                                   couts=self.hidden_size,
                                   blockdiag=blockdiag,
                                   matmul_dtype=self.matmul_dtype)

        out = pl.pallas_call(
            kernel,
            out_shape=jax.ShapeDtypeStruct((B, Npad, Cpad), self.out_dtype),
            in_specs=[
                pl.BlockSpec(memory_space=pltpu.MemorySpace.VMEM),   # G (bf16)
                pl.BlockSpec(memory_space=pltpu.MemorySpace.VMEM),   # x (padded f32)
                pl.BlockSpec(memory_space=pltpu.MemorySpace.VMEM),   # W stack (bf16)
                pl.BlockSpec(memory_space=pltpu.MemorySpace.SMEM),   # eps (L,)
                pl.BlockSpec(memory_space=pltpu.MemorySpace.VMEM),   # gamma
                pl.BlockSpec(memory_space=pltpu.MemorySpace.VMEM),   # beta
                pl.BlockSpec(memory_space=pltpu.MemorySpace.VMEM),   # mask
            ],
            out_specs=pl.BlockSpec(memory_space=pltpu.MemorySpace.VMEM),
            scratch_shapes=[
                pltpu.VMEM((B, Npad, Cpad), jnp.float32),   # resident h
            ],
            compiler_params=pltpu.CompilerParams(vmem_limit_bytes=vmem_limit),
        )(g_in, x_pad, self.w_stack_mm, self.eps_stack, gamma, beta, mask_pad)

        # Drop pad node rows / pad lanes (glue, plain JAX).
        h = out[:, :N, :self.hidden_size[-1]].astype(jnp.float32)
        if self.residual:
            h = jnp.concatenate([h, x], axis=-1)
        return G, h


if __name__ == "__main__":
    B, N, Cin = 2, 16, 8            # batch, nodes (g_size), input features
    hidden = (32, 32)

    key = jax.random.PRNGKey(0)
    kg, kx, km, kp = jax.random.split(key, 4)

    # Symmetric 0/1 adjacency with self loops, float32.
    adj = (jax.random.uniform(kg, (B, N, N)) > 0.6).astype(jnp.float32)
    G = jnp.clip(adj + jnp.transpose(adj, (0, 2, 1)) + jnp.eye(N)[None], 0.0, 1.0)
    x = jax.random.normal(kx, (B, N, Cin), jnp.float32)
    mask = (jax.random.uniform(km, (B, N, 1)) > 0.2).astype(jnp.float32)

    block = GNNBlockPallas(g_size=N, in_size=Cin, hidden_size=hidden,
                           residual=False, key=kp)

    G_out, h_out = block(G, x, mask)
    jax.block_until_ready(h_out)
    assert G_out.shape == (B, N, N)
    assert h_out.shape == (B, N, block.out_size)
    assert bool(jnp.all(jnp.isfinite(h_out)))
    print("KERNEL_OK")
</pallas_src>

<mosaic_0001>
module attributes {stable_mosaic.version = 11 : i64} {
  func.func @_gnn_block_kernel(%arg0: memref<32x32xbf16, #tpu.memory_space<vmem>>, %arg1: memref<2x16x128xf32, #tpu.memory_space<vmem>>, %arg2: memref<2x128x128xbf16, #tpu.memory_space<vmem>>, %arg3: memref<2xf32, #tpu.memory_space<smem>>, %arg4: memref<2x16x1xf32, #tpu.memory_space<vmem>>, %arg5: memref<2x16x1xf32, #tpu.memory_space<vmem>>, %arg6: memref<2x16x1xf32, #tpu.memory_space<vmem>>, %arg7: memref<2x16x128xf32, #tpu.memory_space<vmem>>, %arg8: memref<2x16x128xf32, #tpu.memory_space<vmem>>) attributes {dimension_semantics = [], scalar_prefetch = 0 : i64, scratch_operands = 1 : i64, tpu.core_type = #tpu.core_type<tc>} {
    %c0 = arith.constant 0 : index
    %c0_0 = arith.constant 0 : index
    %c0_1 = arith.constant 0 : index
    %0 = vector.load %arg6[%c0, %c0_0, %c0_1] : memref<2x16x1xf32, #tpu.memory_space<vmem>>, vector<2x16x1xf32>
    %c0_2 = arith.constant 0 : index
    %c0_3 = arith.constant 0 : index
    %c0_4 = arith.constant 0 : index
    %1 = vector.load %arg1[%c0_2, %c0_3, %c0_4] : memref<2x16x128xf32, #tpu.memory_space<vmem>>, vector<2x16x128xf32>
    %c0_5 = arith.constant 0 : index
    %c0_6 = arith.constant 0 : index
    %c0_7 = arith.constant 0 : index
    %2 = vector.load %arg8[%c0_5, %c0_6, %c0_7] : memref<2x16x128xf32, #tpu.memory_space<vmem>>, vector<2x16x128xf32>
    tpu.vector_store %arg8[%c0_5, %c0_6, %c0_7], %1 {strides = array<i32>} : memref<2x16x128xf32, #tpu.memory_space<vmem>>, vector<2x16x128xf32>,
    %c0_8 = arith.constant 0 : index
    %3 = memref.load %arg3[%c0_8] : memref<2xf32, #tpu.memory_space<smem>>
    %c0_9 = arith.constant 0 : index
    %c0_10 = arith.constant 0 : index
    %c0_11 = arith.constant 0 : index
    %4 = vector.load %arg2[%c0_9, %c0_10, %c0_11] : memref<2x128x128xbf16, #tpu.memory_space<vmem>>, vector<1x128x128xbf16>
    %5 = vector.shape_cast %4 : vector<1x128x128xbf16> to vector<128x128xbf16>
    %c0_12 = arith.constant 0 : index
    %c0_13 = arith.constant 0 : index
    %c0_14 = arith.constant 0 : index
    %6 = vector.load %arg8[%c0_12, %c0_13, %c0_14] : memref<2x16x128xf32, #tpu.memory_space<vmem>>, vector<2x16x128xf32>
    %7 = vector.shape_cast %6 : vector<2x16x128xf32> to vector<32x128xf32>
    %8 = arith.truncf %7 : vector<32x128xf32> to vector<32x128xbf16>
    %c0_15 = arith.constant 0 : index
    %c0_16 = arith.constant 0 : index
    %9 = vector.load %arg0[%c0_15, %c0_16] : memref<32x32xbf16, #tpu.memory_space<vmem>>, vector<32x32xbf16>
    %cst = arith.constant dense<0.000000e+00> : vector<32x128xf32>
    %10 = tpu.matmul %9, %8, %cst {dimension_numbers = #tpu.dot_dimension_numbers<[1], [0], [0], [1], [0, 0, 1, 1], [], []>} : vector<32x32xbf16>, vector<32x128xbf16>, vector<32x128xf32> -> vector<32x128xf32>
    %11 = vector.shape_cast %10 : vector<32x128xf32> to vector<2x16x128xf32>
    %cst_17 = arith.constant 1.000000e+00 : f32
    %12 = arith.addf %cst_17, %3 : f32
    %13 = vector.broadcast %12 : f32 to vector<2x16x128xf32>
    %14 = arith.mulf %13, %6 : vector<2x16x128xf32>
    %15 = arith.addf %11, %14 : vector<2x16x128xf32>
    %16 = vector.shape_cast %15 : vector<2x16x128xf32> to vector<32x128xf32>
    %17 = arith.truncf %16 : vector<32x128xf32> to vector<32x128xbf16>
    %cst_18 = arith.constant dense<0.000000e+00> : vector<32x128xf32>
    %18 = tpu.matmul %17, %5, %cst_18 {dimension_numbers = #tpu.dot_dimension_numbers<[1], [0], [0], [1], [0, 0, 1, 1], [], []>} : vector<32x128xbf16>, vector<128x128xbf16>, vector<32x128xf32> -> vector<32x128xf32>
    %cst_19 = arith.constant 0.000000e+00 : f32
    %19 = vector.broadcast %cst_19 : f32 to vector<32x128xf32>
    %20 = arith.maximumf %18, %19 : vector<32x128xf32>
    %21 = vector.shape_cast %20 : vector<32x128xf32> to vector<2x16x128xf32>
    %cst_20 = arith.constant dense<0.000000e+00> : vector<2x16xf32>
    %22 = vector.multi_reduction <add>, %21, %cst_20 [2] : vector<2x16x128xf32> to vector<2x16xf32>
    %23 = vector.shape_cast %22 : vector<2x16xf32> to vector<2x16x1xf32>
    %24 = arith.mulf %21, %21 : vector<2x16x128xf32>
    %cst_21 = arith.constant dense<0.000000e+00> : vector<2x16xf32>
    %25 = vector.multi_reduction <add>, %24, %cst_21 [2] : vector<2x16x128xf32> to vector<2x16xf32>
    %26 = vector.shape_cast %25 : vector<2x16xf32> to vector<2x16x1xf32>
    %cst_22 = arith.constant dense<0.000000e+00> : vector<16x1xf32>
    %27 = vector.multi_reduction <add>, %23, %cst_22 [0] : vector<2x16x1xf32> to vector<16x1xf32>
    %28 = vector.shape_cast %27 : vector<16x1xf32> to vector<1x16x1xf32>
    %cst_23 = arith.constant 1.562500e-02 : f32
    %29 = vector.broadcast %cst_23 : f32 to vector<1x16x1xf32>
    %30 = arith.mulf %28, %29 : vector<1x16x1xf32>
    %cst_24 = arith.constant dense<0.000000e+00> : vector<16x1xf32>
    %31 = vector.multi_reduction <add>, %26, %cst_24 [0] : vector<2x16x1xf32> to vector<16x1xf32>
    %32 = vector.shape_cast %31 : vector<16x1xf32> to vector<1x16x1xf32>
    %cst_25 = arith.constant 1.562500e-02 : f32
    %33 = vector.broadcast %cst_25 : f32 to vector<1x16x1xf32>
    %34 = arith.mulf %32, %33 : vector<1x16x1xf32>
    %35 = arith.mulf %30, %30 : vector<1x16x1xf32>
    %36 = arith.subf %34, %35 : vector<1x16x1xf32>
    %cst_26 = arith.constant 0.000000e+00 : f32
    %37 = vector.broadcast %cst_26 : f32 to vector<1x16x1xf32>
    %38 = arith.maximumf %36, %37 : vector<1x16x1xf32>
    %cst_27 = arith.constant 9.99999974E-6 : f32
    %39 = vector.broadcast %cst_27 : f32 to vector<1x16x1xf32>
    %40 = arith.addf %38, %39 : vector<1x16x1xf32>
    %41 = math.rsqrt %40 : vector<1x16x1xf32>
    %c0_28 = arith.constant 0 : index
    %c0_29 = arith.constant 0 : index
    %c0_30 = arith.constant 0 : index
    %42 = vector.load %arg4[%c0_28, %c0_29, %c0_30] : memref<2x16x1xf32, #tpu.memory_space<vmem>>, vector<1x16x1xf32>
    %43 = vector.shape_cast %42 : vector<1x16x1xf32> to vector<16x1xf32>
    %44 = vector.shape_cast %43 : vector<16x1xf32> to vector<1x16x1xf32>
    %c0_31 = arith.constant 0 : index
    %c0_32 = arith.constant 0 : index
    %c0_33 = arith.constant 0 : index
    %45 = vector.load %arg5[%c0_31, %c0_32, %c0_33] : memref<2x16x1xf32, #tpu.memory_space<vmem>>, vector<1x16x1xf32>
    %46 = vector.shape_cast %45 : vector<1x16x1xf32> to vector<16x1xf32>
    %47 = vector.shape_cast %46 : vector<16x1xf32> to vector<1x16x1xf32>
    %48 = vector.broadcast %30 : vector<1x16x1xf32> to vector<2x16x128xf32>
    %49 = arith.subf %21, %48 : vector<2x16x128xf32>
    %50 = arith.mulf %41, %44 : vector<1x16x1xf32>
    %51 = vector.broadcast %50 : vector<1x16x1xf32> to vector<2x16x128xf32>
    %52 = arith.mulf %49, %51 : vector<2x16x128xf32>
    %53 = vector.broadcast %47 : vector<1x16x1xf32> to vector<2x16x128xf32>
    %54 = arith.addf %52, %53 : vector<2x16x128xf32>
    %55 = vector.broadcast %0 : vector<2x16x1xf32> to vector<2x16x128xf32>
    %56 = arith.mulf %54, %55 : vector<2x16x128xf32>
    %c0_34 = arith.constant 0 : index
    %c0_35 = arith.constant 0 : index
    %c0_36 = arith.constant 0 : index
    %57 = vector.load %arg8[%c0_34, %c0_35, %c0_36] : memref<2x16x128xf32, #tpu.memory_space<vmem>>, vector<2x16x128xf32>
    tpu.vector_store %arg8[%c0_34, %c0_35, %c0_36], %56 {strides = array<i32>} : memref<2x16x128xf32, #tpu.memory_space<vmem>>, vector<2x16x128xf32>,
    %c1 = arith.constant 1 : index
    %58 = memref.load %arg3[%c1] : memref<2xf32, #tpu.memory_space<smem>>
    %c1_37 = arith.constant 1 : index
    %c0_38 = arith.constant 0 : index
    %c0_39 = arith.constant 0 : index
    %59 = vector.load %arg2[%c1_37, %c0_38, %c0_39] : memref<2x128x128xbf16, #tpu.memory_space<vmem>>, vector<1x128x128xbf16>
    %60 = vector.shape_cast %59 : vector<1x128x128xbf16> to vector<128x128xbf16>
    %c0_40 = arith.constant 0 : index
    %c0_41 = arith.constant 0 : index
    %c0_42 = arith.constant 0 : index
    %61 = vector.load %arg8[%c0_40, %c0_41, %c0_42] : memref<2x16x128xf32, #tpu.memory_space<vmem>>, vector<2x16x128xf32>
    %62 = vector.shape_cast %61 : vector<2x16x128xf32> to vector<32x128xf32>
    %63 = arith.truncf %62 : vector<32x128xf32> to vector<32x128xbf16>
    %c0_43 = arith.constant 0 : index
    %c0_44 = arith.constant 0 : index
    %64 = vector.load %arg0[%c0_43, %c0_44] : memref<32x32xbf16, #tpu.memory_space<vmem>>, vector<32x32xbf16>
    %cst_45 = arith.constant dense<0.000000e+00> : vector<32x128xf32>
    %65 = tpu.matmul %64, %63, %cst_45 {dimension_numbers = #tpu.dot_dimension_numbers<[1], [0], [0], [1], [0, 0, 1, 1], [], []>} : vector<32x32xbf16>, vector<32x128xbf16>, vector<32x128xf32> -> vector<32x128xf32>
    %66 = vector.shape_cast %65 : vector<32x128xf32> to vector<2x16x128xf32>
    %cst_46 = arith.constant 1.000000e+00 : f32
    %67 = arith.addf %cst_46, %58 : f32
    %68 = vector.broadcast %67 : f32 to vector<2x16x128xf32>
    %69 = arith.mulf %68, %61 : vector<2x16x128xf32>
    %70 = arith.addf %66, %69 : vector<2x16x128xf32>
    %71 = vector.shape_cast %70 : vector<2x16x128xf32> to vector<32x128xf32>
    %72 = arith.truncf %71 : vector<32x128xf32> to vector<32x128xbf16>
    %cst_47 = arith.constant dense<0.000000e+00> : vector<32x128xf32>
    %73 = tpu.matmul %72, %60, %cst_47 {dimension_numbers = #tpu.dot_dimension_numbers<[1], [0], [0], [1], [0, 0, 1, 1], [], []>} : vector<32x128xbf16>, vector<128x128xbf16>, vector<32x128xf32> -> vector<32x128xf32>
    %cst_48 = arith.constant 0.000000e+00 : f32
    %74 = vector.broadcast %cst_48 : f32 to vector<32x128xf32>
    %75 = arith.maximumf %73, %74 : vector<32x128xf32>
    %76 = vector.shape_cast %75 : vector<32x128xf32> to vector<2x16x128xf32>
    %cst_49 = arith.constant dense<0.000000e+00> : vector<2x16xf32>
    %77 = vector.multi_reduction <add>, %76, %cst_49 [2] : vector<2x16x128xf32> to vector<2x16xf32>
    %78 = vector.shape_cast %77 : vector<2x16xf32> to vector<2x16x1xf32>
    %79 = arith.mulf %76, %76 : vector<2x16x128xf32>
    %cst_50 = arith.constant dense<0.000000e+00> : vector<2x16xf32>
    %80 = vector.multi_reduction <add>, %79, %cst_50 [2] : vector<2x16x128xf32> to vector<2x16xf32>
    %81 = vector.shape_cast %80 : vector<2x16xf32> to vector<2x16x1xf32>
    %cst_51 = arith.constant dense<0.000000e+00> : vector<16x1xf32>
    %82 = vector.multi_reduction <add>, %78, %cst_51 [0] : vector<2x16x1xf32> to vector<16x1xf32>
    %83 = vector.shape_cast %82 : vector<16x1xf32> to vector<1x16x1xf32>
    %cst_52 = arith.constant 1.562500e-02 : f32
    %84 = vector.broadcast %cst_52 : f32 to vector<1x16x1xf32>
    %85 = arith.mulf %83, %84 : vector<1x16x1xf32>
    %cst_53 = arith.constant dense<0.000000e+00> : vector<16x1xf32>
    %86 = vector.multi_reduction <add>, %81, %cst_53 [0] : vector<2x16x1xf32> to vector<16x1xf32>
    %87 = vector.shape_cast %86 : vector<16x1xf32> to vector<1x16x1xf32>
    %cst_54 = arith.constant 1.562500e-02 : f32
    %88 = vector.broadcast %cst_54 : f32 to vector<1x16x1xf32>
    %89 = arith.mulf %87, %88 : vector<1x16x1xf32>
    %90 = arith.mulf %85, %85 : vector<1x16x1xf32>
    %91 = arith.subf %89, %90 : vector<1x16x1xf32>
    %cst_55 = arith.constant 0.000000e+00 : f32
    %92 = vector.broadcast %cst_55 : f32 to vector<1x16x1xf32>
    %93 = arith.maximumf %91, %92 : vector<1x16x1xf32>
    %cst_56 = arith.constant 9.99999974E-6 : f32
    %94 = vector.broadcast %cst_56 : f32 to vector<1x16x1xf32>
    %95 = arith.addf %93, %94 : vector<1x16x1xf32>
    %96 = math.rsqrt %95 : vector<1x16x1xf32>
    %c1_57 = arith.constant 1 : index
    %c0_58 = arith.constant 0 : index
    %c0_59 = arith.constant 0 : index
    %97 = vector.load %arg4[%c1_57, %c0_58, %c0_59] : memref<2x16x1xf32, #tpu.memory_space<vmem>>, vector<1x16x1xf32>
    %98 = vector.shape_cast %97 : vector<1x16x1xf32> to vector<16x1xf32>
    %99 = vector.shape_cast %98 : vector<16x1xf32> to vector<1x16x1xf32>
    %c1_60 = arith.constant 1 : index
    %c0_61 = arith.constant 0 : index
    %c0_62 = arith.constant 0 : index
    %100 = vector.load %arg5[%c1_60, %c0_61, %c0_62] : memref<2x16x1xf32, #tpu.memory_space<vmem>>, vector<1x16x1xf32>
    %101 = vector.shape_cast %100 : vector<1x16x1xf32> to vector<16x1xf32>
    %102 = vector.shape_cast %101 : vector<16x1xf32> to vector<1x16x1xf32>
    %103 = vector.broadcast %85 : vector<1x16x1xf32> to vector<2x16x128xf32>
    %104 = arith.subf %76, %103 : vector<2x16x128xf32>
    %105 = arith.mulf %96, %99 : vector<1x16x1xf32>
    %106 = vector.broadcast %105 : vector<1x16x1xf32> to vector<2x16x128xf32>
    %107 = arith.mulf %104, %106 : vector<2x16x128xf32>
    %108 = vector.broadcast %102 : vector<1x16x1xf32> to vector<2x16x128xf32>
    %109 = arith.addf %107, %108 : vector<2x16x128xf32>
    %110 = vector.broadcast %0 : vector<2x16x1xf32> to vector<2x16x128xf32>
    %111 = arith.mulf %109, %110 : vector<2x16x128xf32>
    %c0_63 = arith.constant 0 : index
    %c0_64 = arith.constant 0 : index
    %c0_65 = arith.constant 0 : index
    %112 = vector.load %arg8[%c0_63, %c0_64, %c0_65] : memref<2x16x128xf32, #tpu.memory_space<vmem>>, vector<2x16x128xf32>
    tpu.vector_store %arg8[%c0_63, %c0_64, %c0_65], %111 {strides = array<i32>} : memref<2x16x128xf32, #tpu.memory_space<vmem>>, vector<2x16x128xf32>,
    %c0_66 = arith.constant 0 : index
    %c0_67 = arith.constant 0 : index
    %c0_68 = arith.constant 0 : index
    %113 = vector.load %arg8[%c0_66, %c0_67, %c0_68] : memref<2x16x128xf32, #tpu.memory_space<vmem>>, vector<2x16x128xf32>
    %c0_69 = arith.constant 0 : index
    %c0_70 = arith.constant 0 : index
    %c0_71 = arith.constant 0 : index
    %114 = vector.load %arg7[%c0_69, %c0_70, %c0_71] : memref<2x16x128xf32, #tpu.memory_space<vmem>>, vector<2x16x128xf32>
    tpu.vector_store %arg7[%c0_69, %c0_70, %c0_71], %113 {strides = array<i32>} : memref<2x16x128xf32, #tpu.memory_space<vmem>>, vector<2x16x128xf32>,
    return
  }
}

</mosaic_0001>

<bundles_post_ra>
// kernel: tpu_custom_call.1
= control target key start
LH: loop header
LB: loop body
LE: loop exit
PB: predicated region body
PF: predicated region fallthrough
CT: control target
= control target key end

     0   :  { %12 = vsyncpa [#allocation4], 0  ;;  %s1077_s0 = inlined_call_operand.vmem [shape: bf16[32,32], index: 0, kind: input, shape index: {}]   ;;  %s1078_s1 = inlined_call_operand.vmem [shape: f32[2,16,128], index: 1, kind: input, shape index: {}]   ;;  %s1079_s2 = inlined_call_operand.hbm [shape: bf16[2,128,128], index: 2, kind: input, shape index: {}]   ;;  %s1080_s3 = inlined_call_operand.vmem [shape: f32[2], index: 3, kind: input, shape index: {}]   ;;  %s1081_s4 = inlined_call_operand.vmem [shape: f32[2,16,1], index: 4, kind: input, shape index: {}]   ;;  %s1082_s5 = inlined_call_operand.vmem [shape: f32[2,16,1], index: 5, kind: input, shape index: {}]   ;;  %s1083_s6 = inlined_call_operand.vmem [shape: f32[2,16,1], index: 6, kind: input, shape index: {}]   ;;  %s1084_s7 = inlined_call_operand.hbm [shape: f32[2,16,128], index: 7, kind: output, shape index: {}]  }
   0x1   :  { %13 = vsyncpa [#allocation6], 0 }
   0x2   :  { %14 = vsyncpa [#allocation5], 0  ;;  %s904_s24 = smov [#allocation3]   ;;  %s37_s28 = sshll.u32 %s1080_s3, 4  ;;  %s38_s28 = int_to_ptr.vmem [resolvable:$true] %s37_s28 }
   0x3   :  { %s24_s25 = sshll.u32 %s904_s24, 4  ;;  %s25_s25 = int_to_ptr.vmem [resolvable:$true] %s24_s25 }
   0x4   :  { %s854_s29 = scalar_lea.vmem %s25_s25, 2048  ;;  %p859_p1 = scmp.lt.s32.totalorder %s25_s25, %s25_s25 }
   0x5   :  { %p855_p0 = scmp.ne.s32.totalorder %s25_s25, %s854_s29  ;;  %p860_p2 = scmp.lt.s32.totalorder %s854_s29, %s854_s29 }
   0x7   :  { %p861_p3 = por %p860_p2, %p859_p1 }
   0x9   :  { %p862_p4 = pnand %p861_p3, %p855_p0 }
   0xb   :  { %865 = shalt.err (!%p862_p4)
}
   0xc   :  { %s905_s30 = smov 64   ;;  %s906_s8 = smov 4  }
   0xd   :  { %30 = dma.hbm_to_vmem [thread:$0]  %s1079_s2, 2048, %s25_s25, [#allocation4], %s905_s30, %s905_s30, %s906_s8  }
   0xe   :  { %s866_s11 = scalar_lea.vmem %s38_s28, 16  ;;  %p871_p6 = scmp.lt.s32.totalorder %s38_s28, %s38_s28 }
   0xf   :  { %p867_p5 = scmp.ne.s32.totalorder %s38_s28, %s866_s11  ;;  %p872_p7 = scmp.lt.s32.totalorder %s866_s11, %s866_s11 }
  0x11   :  { %p873_p8 = por %p872_p7, %p871_p6 }
  0x13   :  { %p874_p9 = pnand %p873_p8, %p867_p5 }
  0x15   :  { %877 = shalt.err (!%p874_p9)
}
  0x16   :  { %s907_s3 = smov [#allocation7]  }
  0x17   :  { %40 = dma.vmem_to_smem %s38_s28, 16, %s907_s3, [#allocation6]  }
  0x18   :  { %898 = dma.done.wait [#allocation4], 2048  }
  0x19   :  { %899 = vsyncadd [#allocation4], 4294965248 }
  0x1a   :  { %900 = dma.done.wait [#allocation6], 16  }
  0x1b   :  { %901 = vsyncadd [#allocation6], 4294967280 }
  0x1c   :  { %53 = sfence }
  0x1d   :  { %v61_v0 = vld [vmem:[%s1078_s1 + $0x10] sm:$0xff]  ;;  %v62_v1 = vld [vmem:[%s1078_s1 + $0x18] sm:$0xff]  ;;  %v59_v2 = vld [vmem:[%s1078_s1] sm:$0xff]  ;;  %vm104_vm0 = vcmask 261120   ;;  %v908_v43 = vmov 0  }
  0x1e   :  { %v89_v3 = vpack.c.bf16 %v62_v1, %v61_v0  ;;  %v60_v4 = vld [vmem:[%s1078_s1 + $0x8] sm:$0xff]  ;;  %v818_v6 = vld [vmem:[%s1077_s0] sm:$0xff]   ;;  %v820_v7 = vld [vmem:[#allocation3 + $0x38] sm:$0xff]   ;;  %s67_s1 = sld [smem:[#allocation7]]  ;;  %817 = vset.pattern.permute.xlu1 %v908_v43  ;;  %816 = vset.pattern.permute.xlu0 %v908_v43 }
  0x1f   :  { %v88_v5 = vpack.c.bf16 %v60_v4, %v59_v2  ;;  %756 = vmatprep.mubr.msk.bf16.mxu1 %vm104_vm0, %v818_v6  ;;  %v819_v8 = vld [vmem:[%s1077_s0 + $0x8] sm:$0xff]   ;;  %v821_v9 = vld [vmem:[#allocation3 + $0x30] sm:$0xff]   ;;  %v823_v11 = vld [vmem:[#allocation3 + $0x20] sm:$0xff]  }
  0x20   :  { %752 = vmatprep.subr.bf16.mxu1 %v89_v3  ;;  %v822_v10 = vld [vmem:[#allocation3 + $0x28] sm:$0xff]   ;;  %v824_v12 = vld [vmem:[#allocation3 + $0x18] sm:$0xff]   ;;  %v825_v13 = vld [vmem:[#allocation3 + $0x10] sm:$0xff]  }
  0x21   :  { %753 = vmatpush3.bf16.msra.mxu1 %v89_v3  ;;  %v826_v14 = vld [vmem:[#allocation3 + $0x8] sm:$0xff]   ;;  %v827_v15 = vld [vmem:[#allocation3] sm:$0xff]   ;;  %v57_v46 = vld [vmem:[%s1083_s6 + $0x10] sm:$0xff] }
  0x22   :  { %754 = vmatprep.subr.bf16.mxu1 %v88_v5  ;;  %v313_v44 = vld [vmem:[%s1082_s5] sm:$0xff]  ;;  %v314_v45 = vld [vmem:[%s1082_s5 + $0x8] sm:$0xff]  ;;  %v58_v47 = vld [vmem:[%s1083_s6 + $0x18] sm:$0xff] }
  0x23   :  { %v830_v43 = vld [vmem:[#allocation3 + $0x78] sm:$0xff]  }
  0x24   :  { %s160_s23 = sadd.f32 1.0, %s67_s1 }
  0x25   :  { %755 = vmatpush3.bf16.msra.mxu1 %v88_v5 }
  0x26   :  { %760 = vmatprep.subr.bf16.mxu1 %v820_v7  ;;  %v161_v17 = vstv %s160_s23 }
  0x27   :  { %v165_v19 = vmul.f32 %v161_v17, %v62_v1  ;;  %v162_v20 = vmul.f32 %v161_v17, %v59_v2  ;;  %v163_v21 = vmul.f32 %v161_v17, %v60_v4  ;;  %v164_v22 = vmul.f32 %v161_v17, %v61_v0 }
  0x28   :  { %757 = vmatmul.mubr.msk.bf16.vlgmr.msra.gmra.mxu1 %vm104_vm0, %v819_v8  ;;  %v312_v8 = vld [vmem:[%s1081_s4 + $0x8] sm:$0xff] }
  0x29   :  { %761 = vmatpush3.bf16.msra.mxu1 %v820_v7 }
  0x2a   :  { %762 = vmatprep.subr.bf16.mxu1 %v821_v9 }
  0x2d   :  { %763 = vmatpush3.bf16.msra.mxu1 %v821_v9 }
  0x2e   :  { %764 = vmatprep.subr.bf16.mxu1 %v822_v10 }
  0x31   :  { %765 = vmatpush3.bf16.msra.mxu1 %v822_v10  ;;  %v311_v10 = vld [vmem:[%s1081_s4] sm:$0xff] }
  0x32   :  { %766 = vmatprep.subr.bf16.mxu1 %v823_v11 }
  0x35   :  { %767 = vmatpush3.bf16.msra.mxu1 %v823_v11 }
  0x36   :  { %768 = vmatprep.subr.bf16.mxu1 %v824_v12 }
  0x39   :  { %769 = vmatpush3.bf16.msra.mxu1 %v824_v12 }
  0x3a   :  { %770 = vmatprep.subr.bf16.mxu1 %v825_v13 }
  0x3d   :  { %771 = vmatpush3.bf16.msra.mxu1 %v825_v13 }
  0x3e   :  { %772 = vmatprep.subr.bf16.mxu1 %v826_v14 }
  0x41   :  { %773 = vmatpush3.bf16.msra.mxu1 %v826_v14  ;;  %v55_v14 = vld [vmem:[%s1083_s6] sm:$0xff] }
  0x42   :  { %774 = vmatprep.subr.bf16.mxu1 %v827_v15 }
  0x45   :  { %775 = vmatpush3.bf16.msra.mxu1 %v827_v15  ;;  %v56_v15 = vld [vmem:[%s1083_s6 + $0x8] sm:$0xff] }
  0xe8   :  { %v758_v16 = vpop.f32.mrf.mxu1 }
  0xe9   :  { %v168_v28 = vadd.f32 %v758_v16, %v164_v22  ;;  %v828_v16 = vld [vmem:[%s1077_s0] sm:$0xff]  }
  0xea   :  { %v145_v18 = vpop.f32.mrf.mxu1  ;;  %784 = vmatprep.mubr.msk.bf16.mxu0 %vm104_vm0, %v828_v16 }
  0xeb   :  { %v166_v26 = vadd.f32 %v162_v20, %v145_v18 }
  0xec   :  { %v759_v23 = vpop.f32.mrf.mxu1 }
  0xed   :  { %v169_v24 = vadd.f32 %v759_v23, %v165_v19 }
  0xee   :  { %v148_v25 = vpop.f32.mrf.mxu1 }
  0xef   :  { %v167_v27 = vadd.f32 %v163_v21, %v148_v25  ;;  %v171_v30 = vpack.c.bf16 %v169_v24, %v168_v28 }
  0xf1   :  { %v170_v29 = vpack.c.bf16 %v167_v27, %v166_v26 }
  0xf3   :  { %776 = vmatprep.mubr.bf16.mxu1 %v170_v29 }
  0xf4   :  { %777 = vmatmul.mubr.bf16.vlgmr.msra.gmra.mxu1 %v171_v30 }
 0x1b4   :  { %v778_v31 = vpop.f32.mrf.mxu1 }
 0x1b5   :  { %v978_v32 = vmax.f32 %v778_v31, 0.0 }
 0x1b6   :  { %v254_v33 = vpop.f32.mrf.mxu1 }
 0x1b7   :  { %v980_v34 = vmax.f32 %v254_v33, 0.0  ;;  %277 = vadd.xlane.f32.xlu1 %v978_v32  ;;  %v283_v42 = vmul.f32 %v978_v32, %v978_v32 }
 0x1b8   :  { %v779_v35 = vpop.f32.mrf.mxu1 }
 0x1b9   :  { %v983_v36 = vmax.f32 %v779_v35, 0.0  ;;  %273 = vadd.xlane.f32.xlu0 %v980_v34  ;;  %v281_v39 = vmul.f32 %v980_v34, %v980_v34 }
 0x1ba   :  { %v257_v37 = vpop.f32.mrf.mxu1 }
 0x1bb   :  { %v986_v38 = vmax.f32 %v257_v37, 0.0  ;;  %279 = vadd.xlane.f32.xlu1 %v983_v36  ;;  %v284_v41 = vmul.f32 %v983_v36, %v983_v36 }
 0x1bd   :  { %285 = vadd.xlane.f32.xlu0 %v281_v39  ;;  %v282_v40 = vmul.f32 %v986_v38, %v986_v38 }
 0x1bf   :  { %287 = vadd.xlane.f32.xlu1 %v282_v40 }
 0x1c1   :  { %275 = vadd.xlane.f32.xlu0 %v986_v38 }
 0x1c3   :  { %291 = vadd.xlane.f32.xlu1 %v284_v41 }
 0x1c5   :  { %289 = vadd.xlane.f32.xlu0 %v283_v42 }
 0x1d4   :  { %337 = vperm.xlu1 %817, %v313_v44   ;;  %v829_v44 = vld [vmem:[%s1077_s0 + $0x8] sm:$0xff]   ;;  %s707_s0 = sld [smem:[#allocation7 + $0x1]] }
 0x1d8   :  { %342 = vperm.xlu1 %817, %v314_v45   ;;  %v831_v45 = vld [vmem:[#allocation3 + $0x70] sm:$0xff]  }
 0x1da   :  { %s470_s18 = sadd.f32 1.0, %s707_s0 }
 0x1dc   :  { %361 = vperm.xlu1 %817, %v57_v46   ;;  %v832_v46 = vld [vmem:[#allocation3 + $0x68] sm:$0xff]  }
 0x1e0   :  { %366 = vperm.xlu1 %817, %v58_v47   ;;  %v833_v47 = vld [vmem:[#allocation3 + $0x60] sm:$0xff]  }
 0x240   :  { %v278_v48 = vpop.xlane.xlu1 %277 }
 0x242   :  { %v274_v49 = vpop.xlane.xlu0 %273 }
 0x243   :  { %v293_v53 = vadd.f32 %v278_v48, %v274_v49  ;;  %v834_v48 = vld [vmem:[#allocation3 + $0x58] sm:$0xff]   ;;  %v835_v49 = vld [vmem:[#allocation3 + $0x50] sm:$0xff]  }
 0x244   :  { %v280_v50 = vpop.xlane.xlu1 %279 }
 0x245   :  { %v295_v57 = vmul.f32 0.015625, %v293_v53  ;;  %v471_v53 = vstv %s470_s18 }
 0x246   :  { %v286_v51 = vpop.xlane.xlu0 %285 }
 0x247   :  { %v301_v1 = vmul.f32 %v295_v57, %v295_v57  ;;  %v315_v25 = vsub.f32 %v980_v34, %v295_v57  ;;  %v317_v26 = vsub.f32 %v978_v32, %v295_v57 }
 0x248   :  { %v288_v52 = vpop.xlane.xlu1 %287 }
 0x24a   :  { %v276_v54 = vpop.xlane.xlu0 %275 }
 0x24b   :  { %v294_v55 = vadd.f32 %v280_v50, %v276_v54  ;;  %v836_v50 = vld [vmem:[#allocation3 + $0x48] sm:$0xff]  }
 0x24c   :  { %v292_v56 = vpop.xlane.xlu1 %291 }
 0x24d   :  { %v296_v58 = vmul.f32 0.015625, %v294_v55  ;;  %v298_v59 = vadd.f32 %v292_v56, %v288_v52 }
 0x24e   :  { %v290_v60 = vpop.xlane.xlu0 %289 }
 0x24f   :  { %v302_v61 = vmul.f32 %v296_v58, %v296_v58  ;;  %v300_v62 = vmul.f32 0.015625, %v298_v59  ;;  %v297_v63 = vadd.f32 %v290_v60, %v286_v51  ;;  %v318_v21 = vsub.f32 %v983_v36, %v296_v58  ;;  %v837_v51 = vld [vmem:[#allocation3 + $0x40] sm:$0xff]  }
 0x250   :  { %v338_v17 = vpop.permute.xlu1 %337  ;;  %v316_v23 = vsub.f32 %v986_v38, %v296_v58 }
 0x251   :  { %v304_v0 = vsub.f32 %v300_v62, %v302_v61  ;;  %v299_v2 = vmul.f32 0.015625, %v297_v63 }
 0x253   :  { %v306_v3 = vmax.f32 %v304_v0, 0.0  ;;  %v303_v4 = vsub.f32 %v299_v2, %v301_v1 }
 0x254   :  { %v343_v18 = vpop.permute.xlu1 %342 }
 0x255   :  { %v308_v5 = vadd.f32 1e-05, %v306_v3  ;;  %v305_v6 = vmax.f32 %v303_v4, 0.0 }
 0x257   :  { %838 = vrsqrt.f32 %v308_v5  ;;  %v307_v7 = vadd.f32 1e-05, %v305_v6 }
 0x258   :  { %v1026_v19 = vpop.permute.xlu1 %361 }
 0x259   :  { %840 = vrsqrt.f32 %v307_v7 }
 0x25c   :  { %v1028_v20 = vpop.permute.xlu1 %366 }
 0x264   :  { %v839_v9 = vpop.eup %838 }
 0x265   :  { %v320_v11 = vmul.f32 %v839_v9, %v312_v8 }
 0x266   :  { %v841_v12 = vpop.eup %840 }
 0x267   :  { %328 = vperm.xlu1 %817, %v320_v11   ;;  %v319_v13 = vmul.f32 %v841_v12, %v311_v10 }
 0x269   :  { %323 = vperm.xlu0 %816, %v319_v13  }
 0x26b   :  { %351 = vperm.xlu1 %817, %v55_v14  }
 0x26f   :  { %356 = vperm.xlu1 %817, %v56_v15  }
 0x2e2   :  { %v329_v22 = vpop.permute.xlu1 %328 }
 0x2e3   :  { %v334_v24 = vmul.f32 %v329_v22, %v318_v21  ;;  %v332_v28 = vmul.f32 %v329_v22, %v316_v23 }
 0x2e4   :  { %v324_v27 = vpop.permute.xlu0 %323 }
 0x2e5   :  { %v348_v29 = vadd.f32 %v343_v18, %v334_v24  ;;  %v331_v30 = vmul.f32 %v324_v27, %v315_v25  ;;  %v333_v31 = vmul.f32 %v324_v27, %v317_v26  ;;  %v346_v39 = vadd.f32 %v343_v18, %v332_v28 }
 0x2e6   :  { %v1034_v33 = vpop.permute.xlu1 %351 }
 0x2e7   :  { %v347_v35 = vadd.f32 %v338_v17, %v333_v31  ;;  %v345_v37 = vadd.f32 %v338_v17, %v331_v30  ;;  %v372_v40 = vmul.f32 %v1028_v20, %v348_v29 }
 0x2e9   :  { %v371_v36 = vmul.f32 %v1026_v19, %v347_v35  ;;  %v369_v34 = vmul.f32 %v1034_v33, %v345_v37  ;;  %v475_v56 = vmul.f32 %v471_v53, %v372_v40 }
 0x2ea   :  { %v1038_v38 = vpop.permute.xlu1 %356 }
 0x2eb   :  { %v370_v32 = vmul.f32 %v1038_v38, %v346_v39  ;;  %v400_v41 = vpack.c.bf16 %v372_v40, %v371_v36  ;;  %v474_v55 = vmul.f32 %v471_v53, %v371_v36  ;;  %v472_v59 = vmul.f32 %v471_v53, %v369_v34 }
 0x2ed   :  { %v399_v42 = vpack.c.bf16 %v370_v32, %v369_v34  ;;  %780 = vmatprep.subr.bf16.mxu0 %v400_v41  ;;  %v473_v61 = vmul.f32 %v471_v53, %v370_v32 }
 0x2ee   :  { %781 = vmatpush3.bf16.msra.mxu0 %v400_v41 }
 0x2ef   :  { %782 = vmatprep.subr.bf16.mxu0 %v399_v42 }
 0x2f2   :  { %783 = vmatpush3.bf16.msra.mxu0 %v399_v42 }
 0x2f3   :  { %788 = vmatprep.subr.bf16.mxu0 %v830_v43 }
 0x2f5   :  { %785 = vmatmul.mubr.msk.bf16.vlgmr.msra.gmra.mxu0 %vm104_vm0, %v829_v44 }
 0x2f6   :  { %789 = vmatpush3.bf16.msra.mxu0 %v830_v43  ;;  %v720_v43 = vld [vmem:[%s1081_s4 + $0x10] sm:$0xff] }
 0x2f7   :  { %790 = vmatprep.subr.bf16.mxu0 %v831_v45 }
 0x2fa   :  { %791 = vmatpush3.bf16.msra.mxu0 %v831_v45  ;;  %v721_v45 = vld [vmem:[%s1081_s4 + $0x18] sm:$0xff]  ;;  %s909_s4 = smov [#allocation8]  }
 0x2fb   :  { %792 = vmatprep.subr.bf16.mxu0 %v832_v46 }
 0x2fe   :  { %793 = vmatpush3.bf16.msra.mxu0 %v832_v46 }
 0x2ff   :  { %794 = vmatprep.subr.bf16.mxu0 %v833_v47 }
 0x302   :  { %795 = vmatpush3.bf16.msra.mxu0 %v833_v47 }
 0x303   :  { %796 = vmatprep.subr.bf16.mxu0 %v834_v48 }
 0x306   :  { %797 = vmatpush3.bf16.msra.mxu0 %v834_v48 }
 0x307   :  { %798 = vmatprep.subr.bf16.mxu0 %v835_v49 }
 0x30a   :  { %799 = vmatpush3.bf16.msra.mxu0 %v835_v49  ;;  %v723_v49 = vld [vmem:[%s1082_s5 + $0x18] sm:$0xff] }
 0x30b   :  { %800 = vmatprep.subr.bf16.mxu0 %v836_v50 }
 0x30e   :  { %801 = vmatpush3.bf16.msra.mxu0 %v836_v50  ;;  %v722_v50 = vld [vmem:[%s1082_s5 + $0x10] sm:$0xff]  ;;  %s682_s5 = sshll.u32 %s909_s4, 4  ;;  %s683_s5 = int_to_ptr.vmem [resolvable:$true] %s682_s5 }
 0x30f   :  { %802 = vmatprep.subr.bf16.mxu0 %v837_v51  ;;  %s878_s26 = scalar_lea.vmem %s683_s5, 512  ;;  %p883_p11 = scmp.lt.s32.totalorder %s683_s5, %s683_s5 }
 0x310   :  { %p879_p10 = scmp.ne.s32.totalorder %s683_s5, %s878_s26  ;;  %p884_p12 = scmp.lt.s32.totalorder %s878_s26, %s878_s26 }
 0x312   :  { %803 = vmatpush3.bf16.msra.mxu0 %v837_v51  ;;  %p885_p13 = por %p884_p12, %p883_p11 }
 0x314   :  { %p886_p0 = pnand %p885_p13, %p879_p10 }
 0x3b5   :  { %v786_v52 = vpop.f32.mrf.mxu0 }
 0x3b6   :  { %v478_v58 = vadd.f32 %v786_v52, %v474_v55 }
 0x3b7   :  { %v455_v54 = vpop.f32.mrf.mxu0 }
 0x3b8   :  { %v476_v63 = vadd.f32 %v472_v59, %v455_v54 }
 0x3b9   :  { %v787_v57 = vpop.f32.mrf.mxu0 }
 0x3ba   :  { %v479_v60 = vadd.f32 %v787_v57, %v475_v56 }
 0x3bb   :  { %v458_v62 = vpop.f32.mrf.mxu0 }
 0x3bc   :  { %v481_v0 = vpack.c.bf16 %v479_v60, %v478_v58  ;;  %v477_v1 = vadd.f32 %v473_v61, %v458_v62 }
 0x3be   :  { %v480_v2 = vpack.c.bf16 %v477_v1, %v476_v63 }
 0x3c0   :  { %804 = vmatprep.mubr.bf16.mxu0 %v480_v2 }
 0x3c1   :  { %805 = vmatmul.mubr.bf16.vlgmr.msra.gmra.mxu0 %v481_v0 }
 0x481   :  { %v806_v3 = vpop.f32.mrf.mxu0 }
 0x482   :  { %v1046_v4 = vmax.f32 %v806_v3, 0.0 }
 0x483   :  { %v564_v5 = vpop.f32.mrf.mxu0 }
 0x484   :  { %v1048_v6 = vmax.f32 %v564_v5, 0.0  ;;  %587 = vadd.xlane.f32.xlu0 %v1046_v4  ;;  %v593_v13 = vmul.f32 %v1046_v4, %v1046_v4 }
 0x485   :  { %v807_v7 = vpop.f32.mrf.mxu0 }
 0x486   :  { %583 = vadd.xlane.f32.xlu1 %v1048_v6  ;;  %v591_v8 = vmul.f32 %v1048_v6, %v1048_v6  ;;  %v582_v10 = vmax.f32 %v807_v7, 0.0 }
 0x487   :  { %v567_v9 = vpop.f32.mrf.mxu0 }
 0x488   :  { %v580_v11 = vmax.f32 %v567_v9, 0.0  ;;  %595 = vadd.xlane.f32.xlu0 %v591_v8  ;;  %v594_v14 = vmul.f32 %v582_v10, %v582_v10 }
 0x48a   :  { %589 = vadd.xlane.f32.xlu1 %v582_v10  ;;  %v592_v12 = vmul.f32 %v580_v11, %v580_v11 }
 0x48c   :  { %585 = vadd.xlane.f32.xlu0 %v580_v11 }
 0x48e   :  { %597 = vadd.xlane.f32.xlu1 %v592_v12 }
 0x490   :  { %599 = vadd.xlane.f32.xlu0 %v593_v13 }
 0x492   :  { %601 = vadd.xlane.f32.xlu1 %v594_v14 }
 0x50d   :  { %v588_v15 = vpop.xlane.xlu0 %587 }
 0x50f   :  { %v584_v16 = vpop.xlane.xlu1 %583 }
 0x510   :  { %v603_v21 = vadd.f32 %v588_v15, %v584_v16 }
 0x511   :  { %v596_v17 = vpop.xlane.xlu0 %595 }
 0x512   :  { %v605_v25 = vmul.f32 0.015625, %v603_v21 }
 0x513   :  { %v590_v18 = vpop.xlane.xlu1 %589 }
 0x514   :  { %v611_v30 = vmul.f32 %v605_v25, %v605_v25  ;;  %v627_v55 = vsub.f32 %v1048_v6, %v605_v25  ;;  %v629_v56 = vsub.f32 %v1046_v4, %v605_v25 }
 0x515   :  { %v586_v22 = vpop.xlane.xlu0 %585 }
 0x516   :  { %v604_v23 = vadd.f32 %v590_v18, %v586_v22 }
 0x517   :  { %v598_v24 = vpop.xlane.xlu1 %597 }
 0x518   :  { %v606_v27 = vmul.f32 0.015625, %v604_v23 }
 0x519   :  { %v600_v26 = vpop.xlane.xlu0 %599 }
 0x51a   :  { %v607_v28 = vadd.f32 %v600_v26, %v596_v17  ;;  %v612_v39 = vmul.f32 %v606_v27, %v606_v27  ;;  %v628_v52 = vsub.f32 %v580_v11, %v606_v27  ;;  %v630_v53 = vsub.f32 %v582_v10, %v606_v27 }
 0x51b   :  { %v602_v29 = vpop.xlane.xlu1 %601 }
 0x51c   :  { %v609_v31 = vmul.f32 0.015625, %v607_v28  ;;  %v608_v35 = vadd.f32 %v602_v29, %v598_v24 }
 0x51e   :  { %v613_v37 = vsub.f32 %v609_v31, %v611_v30  ;;  %v610_v36 = vmul.f32 0.015625, %v608_v35 }
 0x520   :  { %v615_v40 = vmax.f32 %v613_v37, 0.0  ;;  %v614_v34 = vsub.f32 %v610_v36, %v612_v39 }
 0x522   :  { %v617_v32 = vadd.f32 1e-05, %v615_v40  ;;  %v616_v41 = vmax.f32 %v614_v34, 0.0 }
 0x524   :  { %842 = vrsqrt.f32 %v617_v32  ;;  %v618_v42 = vadd.f32 1e-05, %v616_v41 }
 0x526   :  { %844 = vrsqrt.f32 %v618_v42 }
 0x531   :  { %v843_v44 = vpop.eup %842 }
 0x532   :  { %v631_v46 = vmul.f32 %v843_v44, %v720_v43 }
 0x533   :  { %v845_v47 = vpop.eup %844 }
 0x534   :  { %635 = vperm.xlu0 %816, %v631_v46   ;;  %v632_v48 = vmul.f32 %v845_v47, %v721_v45 }
 0x536   :  { %640 = vperm.xlu1 %817, %v632_v48  }
 0x538   :  { %654 = vperm.xlu0 %816, %v723_v49  }
 0x53a   :  { %649 = vperm.xlu1 %817, %v722_v50  }
 0x5af   :  { %v636_v51 = vpop.permute.xlu0 %635 }
 0x5b0   :  { %v643_v60 = vmul.f32 %v636_v51, %v627_v55  ;;  %v645_v61 = vmul.f32 %v636_v51, %v629_v56 }
 0x5b1   :  { %v641_v54 = vpop.permute.xlu1 %640 }
 0x5b2   :  { %v644_v57 = vmul.f32 %v641_v54, %v628_v52  ;;  %v646_v58 = vmul.f32 %v641_v54, %v630_v53 }
 0x5b3   :  { %v655_v59 = vpop.permute.xlu0 %654 }
 0x5b4   :  { %v658_v62 = vadd.f32 %v655_v59, %v644_v57  ;;  %v660_v63 = vadd.f32 %v655_v59, %v646_v58 }
 0x5b5   :  { %v650_v0 = vpop.permute.xlu1 %649 }
 0x5b6   :  { %v662_v1 = vmul.f32 %v658_v62, %v1038_v38  ;;  %v664_v2 = vmul.f32 %v660_v63, %v1028_v20  ;;  %v657_v3 = vadd.f32 %v650_v0, %v643_v60  ;;  %v659_v5 = vadd.f32 %v650_v0, %v645_v61 }
 0x5b8   :  { %674 = vst [vmem:[#allocation8 + $0x8] sm:$0xff] %v662_v1  ;;  %676 = vst [vmem:[#allocation8 + $0x18] sm:$0xff] %v664_v2  ;;  %v661_v4 = vmul.f32 %v657_v3, %v1034_v33  ;;  %v663_v6 = vmul.f32 %v659_v5, %v1026_v19 }
 0x5ba   :  { %673 = vst [vmem:[#allocation8] sm:$0xff] %v661_v4  ;;  %675 = vst [vmem:[#allocation8 + $0x10] sm:$0xff] %v663_v6 }
 0x5bb   :  { %889 = shalt.err (!%p886_p0)
}
 0x5bc   :  { %s910_s27 = smov 128   ;;  %s911_s28 = smov 8  }
 0x5bd   :  { %688 = dma.vmem_to_hbm [thread:$0]  %s683_s5, 512, %s1084_s7, [#allocation5], %s910_s27, %s910_s27, %s911_s28  }
 0x5be   :  { %902 = dma.done.wait [#allocation5], 512  }
 0x5bf   :  { %903 = vsyncadd [#allocation5], 4294966784 }
 0x5c0   :  { %692 = vsyncpa [#allocation4], 1 }
 0x5c1   :  { %693 = vsyncpa [#allocation5], 1 }
 0x5c2   :  { %694 = vsyncpa [#allocation6], 1 }

</bundles_post_ra>
